<compile_context>
chip_gen: v7x
topology: tpu7x:2x2x1
jax: 0.10.0
libtpu: 0.0.40
codegen_flags: <defaults>
</compile_context>

<pallas_src>
import functools

import jax
import jax.numpy as jnp
from jax import lax
from jax.experimental import pallas as pl
from jax.experimental.pallas import tpu as pltpu

_LANES = 128
_SUBLANES = 8
_CHUNK_ROWS = 512            # in-kernel reduction chunk (256 KiB f32 intermediate)
_BLOCK_ROWS_32 = 8192        # 4 MiB per input per buffer for f32 inputs
_BLOCK_ROWS_16 = 16384       # same bytes/step for <= 16-bit inputs
_VMEM_LIMIT = 48 << 20       # 2 inputs x 2 buffers x 4 MiB + intermediates, with headroom


def _pow_spec(v, gamma):
    """v ** gamma specialized at trace time (avoids jnp.power's log+exp on EUP)."""
    g = float(gamma)
    if g == 0.0:
        return jnp.ones_like(v)
    if g == float(int(g)) and 1.0 <= g <= 8.0:
        w = v
        for _ in range(int(g) - 1):
            w = w * v
        return w
    return jnp.power(v, g)


def _focal_sum_kernel(x_ref, t_ref, o_ref, *, gamma, block_rows, chunk_rows,
                      n_valid):
    """Reduce one (block_rows, 128) tile of focal loss to an (8, 128) partial sum.

    n_valid is None for fully valid blocks (main call, steady state) or the
    number of valid leading elements (block-local, row-major) for the masked
    tail call.  All masking decisions are made at trace time per chunk, so the
    unmasked path contains no mask work at all.
    """
    acc = jnp.zeros((_SUBLANES, _LANES), jnp.float32)
    for c in range(block_rows // chunk_rows):
        r0 = c * chunk_rows
        if n_valid is not None and r0 * _LANES >= n_valid:
            break  # this chunk (and all later ones) is pure padding
        x = x_ref[r0:r0 + chunk_rows, :].astype(jnp.float32)
        t = t_ref[r0:r0 + chunk_rows, :].astype(jnp.float32)
        # Numerically stable BCE with logits:
        #   bce = max(x, 0) - x * t + log1p(exp(-|x|))
        bce = jnp.maximum(x, 0.0) - x * t + jnp.log1p(jnp.exp(-jnp.abs(x)))
        pt = jnp.exp(-bce)               # exact for soft targets too
        f = _pow_spec(1.0 - pt, gamma) * bce
        if n_valid is not None and (r0 + chunk_rows) * _LANES > n_valid:
            rid = lax.broadcasted_iota(jnp.int32, f.shape, 0)
            cid = lax.broadcasted_iota(jnp.int32, f.shape, 1)
            flat = (r0 + rid) * _LANES + cid     # block-local -> int32 safe
            f = jnp.where(flat < n_valid, f, 0.0)
        # (chunk_rows, 128) -> (8, 128): fold sublane groups, VPU adds only.
        acc = acc + f.reshape(chunk_rows // _SUBLANES, _SUBLANES, _LANES).sum(axis=0)
    o_ref[...] = acc


def _partial_sums_call(x2d, t2d, *, gamma, block_rows, num_blocks, n_valid):
    chunk_rows = _CHUNK_ROWS if block_rows % _CHUNK_ROWS == 0 else block_rows
    kernel = functools.partial(
        _focal_sum_kernel, gamma=gamma, block_rows=block_rows,
        chunk_rows=chunk_rows, n_valid=n_valid)
    return pl.pallas_call(
        kernel,
        out_shape=jax.ShapeDtypeStruct((num_blocks * _SUBLANES, _LANES),
                                       jnp.float32),
        grid_spec=pltpu.PrefetchScalarGridSpec(
            num_scalar_prefetch=0,
            grid=(num_blocks,),
            in_specs=[
                pl.BlockSpec((block_rows, _LANES), lambda i: (i, 0)),
                pl.BlockSpec((block_rows, _LANES), lambda i: (i, 0)),
            ],
            out_specs=pl.BlockSpec((_SUBLANES, _LANES), lambda i: (i, 0)),
        ),
        compiler_params=pltpu.CompilerParams(
            dimension_semantics=("parallel",),
            vmem_limit_bytes=_VMEM_LIMIT,
        ),
    )(x2d, t2d)


def focal_loss(inputs, targets, *, alpha=1.0, gamma=2.0):
    """Mean binary focal loss over all elements (logits=True, reduce=True)."""
    assert inputs.shape == targets.shape
    n = inputs.size
    assert n > 0

    x = inputs.reshape(-1)
    t = targets.reshape(-1)

    small_dtype = (jnp.dtype(inputs.dtype).itemsize <= 2
                   and jnp.dtype(targets.dtype).itemsize <= 2)
    max_rows = _BLOCK_ROWS_16 if small_dtype else _BLOCK_ROWS_32
    sub_align = 16 if small_dtype else _SUBLANES

    rows = -(-n // _LANES)               # ceil(n / 128)
    if rows * _LANES != n:
        # TODO(synk): sub-128 remainder still costs one flat pad copy; a 1-D
        # blocked or manual-DMA path would avoid it, but n % 128 != 0 is rare.
        pad = rows * _LANES - n
        x = jnp.pad(x, (0, pad))
        t = jnp.pad(t, (0, pad))
    x2 = x.reshape(rows, _LANES)          # free reshape when n % 128 == 0
    t2 = t.reshape(rows, _LANES)

    full_rows = n // _LANES               # rows containing no padding at all
    main_blocks = full_rows // max_rows
    main_rows = main_blocks * max_rows

    total = jnp.zeros((), jnp.float32)

    if main_blocks > 0:
        # Copy-free, unmasked steady state over whole in-bounds blocks only.
        main_p = _partial_sums_call(
            x2, t2, gamma=gamma, block_rows=max_rows,
            num_blocks=main_blocks, n_valid=None)
        total = total + jnp.sum(main_p)

    tail_valid = n - main_rows * _LANES
    if tail_valid > 0:
        tail_rows = rows - main_rows
        if main_blocks == 0:
            tx2, tt2 = x2, t2             # whole array, no copy
        else:
            tx2 = x2[main_rows:]          # small (<= one block) tail copy
            tt2 = t2[main_rows:]
        tail_rows_p = -(-tail_rows // sub_align) * sub_align
        if tail_rows_p != tail_rows:
            tx2 = jnp.pad(tx2, ((0, tail_rows_p - tail_rows), (0, 0)))
            tt2 = jnp.pad(tt2, ((0, tail_rows_p - tail_rows), (0, 0)))
        mask_n = None if tail_valid == tail_rows_p * _LANES else tail_valid
        tail_p = _partial_sums_call(
            tx2, tt2, gamma=gamma, block_rows=tail_rows_p,
            num_blocks=1, n_valid=mask_n)
        total = total + jnp.sum(tail_p)

    loss = total / jnp.float32(n)
    if float(alpha) != 1.0:               # alpha hoisted out of the kernel
        loss = loss * jnp.float32(alpha)
    return loss


def _focal_loss_ref(inputs, targets, alpha=1.0, gamma=2.0):
    x = inputs.astype(jnp.float32)
    t = targets.astype(jnp.float32)
    bce = jnp.maximum(x, 0.0) - x * t + jnp.log1p(jnp.exp(-jnp.abs(x)))
    pt = jnp.exp(-bce)
    return jnp.mean(alpha * (1.0 - pt) ** gamma * bce)


if __name__ == "__main__":
    key = jax.random.PRNGKey(0)
    k1, k2 = jax.random.split(key)

    # NCHW-style small shape; FocalLoss is elementwise so any shape works.
    shape = (2, 4, 16, 16)
    inputs = jax.random.normal(k1, shape, dtype=jnp.float32)             # logits
    targets = jax.random.bernoulli(k2, 0.5, shape).astype(jnp.float32)   # {0,1}

    loss = focal_loss(inputs, targets, alpha=1.0, gamma=2.0)
    loss = jax.block_until_ready(loss)

    ref = _focal_loss_ref(inputs, targets, alpha=1.0, gamma=2.0)
    assert jnp.allclose(loss, ref, rtol=1e-5, atol=1e-6), (loss, ref)

    print("KERNEL_OK")
</pallas_src>

<mosaic_0001>
module attributes {stable_mosaic.version = 11 : i64} {
  func.func @_focal_sum_kernel(%arg0: i32, %arg1: memref<16x128xf32, #tpu.memory_space<vmem>>, %arg2: memref<16x128xf32, #tpu.memory_space<vmem>>, %arg3: memref<8x128xf32, #tpu.memory_space<vmem>>) attributes {dimension_semantics = [#tpu.dimension_semantics<parallel>], iteration_bounds = array<i64: 1>, scalar_prefetch = 0 : i64, scratch_operands = 0 : i64, tpu.core_type = #tpu.core_type<tc>, window_params = [{transform_indices = @transform_0, window_bounds = array<i64: 16, 128>}, {transform_indices = @transform_1, window_bounds = array<i64: 16, 128>}, {transform_indices = @transform_2, window_bounds = array<i64: 8, 128>}]} {
    %cst = arith.constant 0.000000e+00 : f32
    %0 = vector.broadcast %cst : f32 to vector<8x128xf32>
    %c0 = arith.constant 0 : index
    %c0_0 = arith.constant 0 : index
    %1 = vector.load %arg1[%c0, %c0_0] : memref<16x128xf32, #tpu.memory_space<vmem>>, vector<16x128xf32>
    %c0_1 = arith.constant 0 : index
    %c0_2 = arith.constant 0 : index
    %2 = vector.load %arg2[%c0_1, %c0_2] : memref<16x128xf32, #tpu.memory_space<vmem>>, vector<16x128xf32>
    %cst_3 = arith.constant 0.000000e+00 : f32
    %3 = vector.broadcast %cst_3 : f32 to vector<16x128xf32>
    %4 = arith.maximumf %1, %3 : vector<16x128xf32>
    %5 = arith.mulf %1, %2 : vector<16x128xf32>
    %6 = arith.subf %4, %5 : vector<16x128xf32>
    %7 = math.absf %1 : vector<16x128xf32>
    %cst_4 = arith.constant 0.000000e+00 : f32
    %8 = vector.broadcast %cst_4 : f32 to vector<16x128xf32>
    %9 = arith.subf %8, %7 : vector<16x128xf32>
    %10 = math.exp %9 : vector<16x128xf32>
    %11 = math.log1p %10 : vector<16x128xf32>
    %12 = arith.addf %6, %11 : vector<16x128xf32>
    %cst_5 = arith.constant 0.000000e+00 : f32
    %13 = vector.broadcast %cst_5 : f32 to vector<16x128xf32>
    %14 = arith.subf %13, %12 : vector<16x128xf32>
    %15 = math.exp %14 : vector<16x128xf32>
    %cst_6 = arith.constant 1.000000e+00 : f32
    %16 = vector.broadcast %cst_6 : f32 to vector<16x128xf32>
    %17 = arith.subf %16, %15 : vector<16x128xf32>
    %18 = arith.mulf %17, %17 : vector<16x128xf32>
    %19 = arith.mulf %18, %12 : vector<16x128xf32>
    %20 = vector.shape_cast %19 : vector<16x128xf32> to vector<2x8x128xf32>
    %cst_7 = arith.constant dense<0.000000e+00> : vector<8x128xf32>
    %21 = vector.multi_reduction <add>, %20, %cst_7 [0] : vector<2x8x128xf32> to vector<8x128xf32>
    %22 = arith.addf %0, %21 : vector<8x128xf32>
    %c0_8 = arith.constant 0 : index
    %c0_9 = arith.constant 0 : index
    %23 = vector.load %arg3[%c0_8, %c0_9] : memref<8x128xf32, #tpu.memory_space<vmem>>, vector<8x128xf32>
    tpu.vector_store %arg3[%c0_8, %c0_9], %22 {strides = array<i32>} : memref<8x128xf32, #tpu.memory_space<vmem>>, vector<8x128xf32>,
    return
  }
  func.func @transform_0(%arg0: i32) -> (i32, i32) {
    %c0_i32 = arith.constant 0 : i32
    %c0_i32_0 = arith.constant 0 : i32
    return %arg0, %c0_i32 : i32, i32
  }
  func.func @transform_1(%arg0: i32) -> (i32, i32) {
    %c0_i32 = arith.constant 0 : i32
    %c0_i32_0 = arith.constant 0 : i32
    return %arg0, %c0_i32 : i32, i32
  }
  func.func @transform_2(%arg0: i32) -> (i32, i32) {
    %c0_i32 = arith.constant 0 : i32
    %c0_i32_0 = arith.constant 0 : i32
    return %arg0, %c0_i32 : i32, i32
  }
}

</mosaic_0001>

<bundles_post_ra>
// kernel: tpu_custom_call.1
= control target key start
LH: loop header
LB: loop body
LE: loop exit
PB: predicated region body
PF: predicated region fallthrough
CT: control target
= control target key end

     0   :  { %7 = vsyncpa [#allocation3], 0  ;;  %s254_s0 = inlined_call_operand.hbm [shape: f32[16,128], index: 0, kind: input, shape index: {}]   ;;  %s255_s1 = inlined_call_operand.hbm [shape: f32[16,128], index: 1, kind: input, shape index: {}]   ;;  %s256_s2 = inlined_call_operand.hbm [shape: f32[8,128], index: 2, kind: output, shape index: {}]  }
   0x1   :  { %8 = vsyncpa [#allocation6], 0 }
   0x2   :  { %9 = vsyncpa [#allocation4], 0  ;;  %s198_s9 = smov [#allocation2]   ;;  %s126_s13 = scalar_lea.hbm %s254_s0, 256 }
   0x3   :  { %s15_s10 = sshll.u32 %s198_s9, 4  ;;  %p127_p0 = scmp.ne.s32.totalorder %s254_s0, %s126_s13  ;;  %s16_s10 = int_to_ptr.vmem [resolvable:$true] %s15_s10 }
   0x4   :  { %p130_p1 = scmp.lt.u32.totalorder %s126_s13, %s254_s0 }
   0x6   :  { %p132_p2 = pnand %p130_p1, %p127_p0 }
   0x8   :  { %135 = shalt.err (!%p132_p2)
}
   0x9   :  { %s136_s18 = scalar_lea.vmem %s16_s10, 256  ;;  %p141_p4 = scmp.lt.s32.totalorder %s16_s10, %s16_s10 }
   0xa   :  { %p137_p3 = scmp.ne.s32.totalorder %s16_s10, %s136_s18  ;;  %p142_p5 = scmp.lt.s32.totalorder %s136_s18, %s136_s18 }
   0xc   :  { %p143_p6 = por %p142_p5, %p141_p4 }
   0xe   :  { %p144_p7 = pnand %p143_p6, %p137_p3 }
  0x10   :  { %147 = shalt.err (!%p144_p7)
}
  0x11   :  { %s199_s19 = smov 128   ;;  %s200_s20 = smov 8  }
  0x12   :  { %21 = dma.hbm_to_vmem [thread:$0]  %s254_s0, 256, %s16_s10, [#allocation3], %s199_s19, %s199_s19, %s200_s20  }
  0x13   :  { %s201_s23 = smov [#allocation5]   ;;  %s148_s27 = scalar_lea.hbm %s255_s1, 256 }
  0x14   :  { %s27_s24 = sshll.u32 %s201_s23, 4  ;;  %p149_p8 = scmp.ne.s32.totalorder %s255_s1, %s148_s27  ;;  %s28_s24 = int_to_ptr.vmem [resolvable:$true] %s27_s24 }
  0x15   :  { %p152_p9 = scmp.lt.u32.totalorder %s148_s27, %s255_s1 }
  0x17   :  { %p154_p10 = pnand %p152_p9, %p149_p8 }
  0x19   :  { %157 = shalt.err (!%p154_p10)
}
  0x1a   :  { %s158_s4 = scalar_lea.vmem %s28_s24, 256  ;;  %p163_p12 = scmp.lt.s32.totalorder %s28_s24, %s28_s24 }
  0x1b   :  { %p159_p11 = scmp.ne.s32.totalorder %s28_s24, %s158_s4  ;;  %p164_p13 = scmp.lt.s32.totalorder %s158_s4, %s158_s4 }
  0x1d   :  { %p165_p0 = por %p164_p13, %p163_p12 }
  0x1f   :  { %p166_p1 = pnand %p165_p0, %p159_p11 }
  0x21   :  { %169 = shalt.err (!%p166_p1)
}
  0x22   :  { %33 = dma.hbm_to_vmem [thread:$0]  %s255_s1, 256, %s28_s24, [#allocation6], %s199_s19, %s199_s19, %s200_s20  }
  0x23   :  { %192 = dma.done.wait [#allocation3], 256  }
  0x24   :  { %193 = vsyncadd [#allocation3], 4294967040 }
  0x25   :  { %194 = dma.done.wait [#allocation6], 256  }
  0x26   :  { %195 = vsyncadd [#allocation6], 4294967040  ;;  %v40_v0 = vld [vmem:[#allocation2] sm:$0xff]  ;;  %v41_v1 = vld [vmem:[#allocation2 + $0x8] sm:$0xff]  ;;  %s202_s1 = smov [#allocation7]  }
  0x27   :  { %v50_v2 = vand.u32 2147483647, %v40_v0  ;;  %v51_v3 = vand.u32 2147483647, %v41_v1  ;;  %v42_v14 = vld [vmem:[#allocation5] sm:$0xff]  ;;  %v43_v15 = vld [vmem:[#allocation5 + $0x8] sm:$0xff] }
  0x28   :  { %v44_v17 = vmax.f32 %v40_v0, 0.0  ;;  %v46_v18 = vmul.f32 %v42_v14, %v40_v0  ;;  %v45_v21 = vmax.f32 %v41_v1, 0.0  ;;  %v47_v22 = vmul.f32 %v43_v15, %v41_v1  ;;  %s99_s6 = sshll.u32 %s202_s1, 4  ;;  %s100_s6 = int_to_ptr.vmem [resolvable:$true] %s99_s6 }
  0x29   :  { %v52_v4 = vsub.f32 0.0, %v50_v2  ;;  %v53_v5 = vsub.f32 0.0, %v51_v3  ;;  %s170_s7 = scalar_lea.vmem %s100_s6, 128  ;;  %p175_p3 = scmp.lt.s32.totalorder %s100_s6, %s100_s6 }
  0x2a   :  { %v48_v26 = vsub.f32 %v44_v17, %v46_v18  ;;  %v49_v29 = vsub.f32 %v45_v21, %v47_v22  ;;  %p171_p2 = scmp.ne.s32.totalorder %s100_s6, %s170_s7  ;;  %p176_p4 = scmp.lt.s32.totalorder %s170_s7, %s170_s7 }
  0x2b   :  { %v54_v6 = vmul.f32 1.442695, %v52_v4  ;;  %v56_v7 = vmul.f32 1.442695, %v53_v5 }
  0x2c   :  { %p177_p5 = por %p176_p4, %p175_p3 }
  0x2d   :  { %114 = vpow2.f32 %v54_v6 }
  0x2e   :  { %116 = vpow2.f32 %v56_v7  ;;  %p178_p6 = pnand %p177_p5, %p171_p2 }
  0x37   :  { %v115_v8 = vpop.eup %114 }
  0x38   :  { %v117_v9 = vpop.eup %116  ;;  %v58_v10 = vadd.f32 1.0, %v115_v8  ;;  %v61_v12 = vmul.f32 -0.5, %v115_v8  ;;  %v64_v19 = vand.u32 2147483647, %v115_v8 }
  0x39   :  { %v67_v11 = vadd.f32 1.0, %v117_v9  ;;  %v70_v13 = vmul.f32 -0.5, %v117_v9  ;;  %v73_v23 = vand.u32 2147483647, %v117_v9 }
  0x3a   :  { %118 = vlog2.f32 %v58_v10  ;;  %v62_v16 = vadd.f32 1.0, %v61_v12  ;;  %vm65_vm0 = vcmp.lt.f32.partialorder %v64_v19, 0.0004427343 }
  0x3b   :  { %120 = vlog2.f32 %v67_v11  ;;  %v71_v20 = vadd.f32 1.0, %v70_v13  ;;  %vm74_vm1 = vcmp.lt.f32.partialorder %v73_v23, 0.0004427343 }
  0x3c   :  { %v63_v24 = vmul.f32 %v115_v8, %v62_v16 }
  0x3d   :  { %v72_v27 = vmul.f32 %v117_v9, %v71_v20 }
  0x44   :  { %v119_v25 = vpop.eup %118 }
  0x45   :  { %v121_v28 = vpop.eup %120  ;;  %v60_v30 = vmul.f32 0.6931472, %v119_v25 }
  0x46   :  { %v69_v31 = vmul.f32 0.6931472, %v121_v28 }
  0x47   :  { %v66_v32 = vsel %vm65_vm0, %v63_v24, %v60_v30 }
  0x48   :  { %v75_v33 = vsel %vm74_vm1, %v72_v27, %v69_v31  ;;  %v76_v34 = vadd.f32 %v66_v32, %v48_v26 }
  0x49   :  { %v77_v35 = vadd.f32 %v75_v33, %v49_v29 }
  0x4a   :  { %v78_v36 = vsub.f32 0.0, %v76_v34 }
  0x4b   :  { %v79_v37 = vsub.f32 0.0, %v77_v35 }
  0x4c   :  { %v80_v38 = vmul.f32 1.442695, %v78_v36 }
  0x4d   :  { %v82_v39 = vmul.f32 1.442695, %v79_v37 }
  0x4e   :  { %122 = vpow2.f32 %v80_v38 }
  0x4f   :  { %124 = vpow2.f32 %v82_v39 }
  0x58   :  { %v123_v40 = vpop.eup %122 }
  0x59   :  { %v125_v41 = vpop.eup %124  ;;  %v84_v42 = vsub.f32 1.0, %v123_v40 }
  0x5a   :  { %v85_v43 = vsub.f32 1.0, %v125_v41 }
  0x5b   :  { %v86_v44 = vmul.f32 %v84_v42, %v84_v42 }
  0x5c   :  { %v87_v45 = vmul.f32 %v85_v43, %v85_v43 }
  0x5d   :  { %v88_v46 = vmul.f32 %v86_v44, %v76_v34 }
  0x5e   :  { %v89_v47 = vmul.f32 %v87_v45, %v77_v35 }
  0x60   :  { %v90_v48 = vadd.f32 %v89_v47, %v88_v46 }
  0x62   :  { %92 = vst [vmem:[#allocation7] sm:$0xff] %v90_v48 }
  0x63   :  { %181 = shalt.err (!%p178_p6)
}
  0x64   :  { %s182_s10 = scalar_lea.hbm %s256_s2, 128 }
  0x65   :  { %p183_p7 = scmp.ne.s32.totalorder %s256_s2, %s182_s10  ;;  %p186_p8 = scmp.lt.u32.totalorder %s182_s10, %s256_s2 }
  0x67   :  { %p188_p9 = pnand %p186_p8, %p183_p7 }
  0x69   :  { %191 = shalt.err (!%p188_p9)
}
  0x6a   :  { %102 = dma.vmem_to_hbm [thread:$0]  %s100_s6, 128, %s256_s2, [#allocation4]  }
  0x6b   :  { %196 = dma.done.wait [#allocation4], 128  }
  0x6c   :  { %197 = vsyncadd [#allocation4], 4294967168 }
  0x6d   :  { %106 = vsyncpa [#allocation3], 1 }
  0x6e   :  { %107 = vsyncpa [#allocation6], 1 }
  0x6f   :  { %108 = vsyncpa [#allocation4], 1 }

</bundles_post_ra>
